<compile_context>
chip_gen: v7x
topology: tpu7x:2x2x1
jax: 0.10.0
libtpu: 0.0.40
codegen_flags: <defaults>
</compile_context>

<pallas_src>
import functools

import jax
import jax.numpy as jnp
from jax.experimental import pallas as pl
from jax.experimental.pallas import tpu as pltpu

# ---- model configuration (small, consistent with the module) ----------------
BATCH      = 2     # batch size
SEQ        = 8     # sequence length
HIDDEN     = 32    # config.hidden_size
N_TARGETS  = 6     # len(args.target_names)
INIT_RANGE = 0.02  # config.initializer_range used by _init_weights
LANE_PAD   = 128   # lane-dense padded output width (multiple of 128)


def head_kernel(hs_ref, w_max_ref, w_cls_ref, b_ref, out_ref,
                max_acc, cls_acc, *, seq_len, seq_tile):
    """Max-over-seq + CLS + split-weight Linear, accumulated over seq tiles.

    hs_ref    : (bt, ts, H)      tile of last_hidden_state (bf16 or f32)
    w_max_ref : (H, LANE_PAD)    fc weight^T for the max-pooled half (f32, padded)
    w_cls_ref : (H, LANE_PAD)    fc weight^T for the CLS half (f32, padded)
    b_ref     : (1, LANE_PAD)    fc bias, zero-padded to 128 lanes
    out_ref   : (bt, LANE_PAD)   lane-dense output (cols >= T are zero)
    max_acc   : (bt, H) scratch  running max over the sequence (f32)
    cls_acc   : (bt, H) scratch  hidden state at sequence position 0 (f32)
    """
    si = pl.program_id(1)                       # sequence-reduction axis (last)
    tile = hs_ref[...].astype(jnp.float32)      # bf16 -> f32 per-tile, in VMEM

    # Mask the tail with -inf only when the last sequence tile is partial
    # (trace-time decision; no mask code emitted when ts divides S).
    if seq_len % seq_tile != 0:
        pos = si * seq_tile + jax.lax.broadcasted_iota(jnp.int32, tile.shape, 1)
        tile = jnp.where(pos < seq_len, tile, -jnp.inf)

    tile_max = jnp.max(tile, axis=1)            # (bt, H) sublane reduce per tile

    @pl.when(si == 0)
    def _init():
        # index_map pins sequence block 0 to s=0, so the CLS token (position 0,
        # always in bounds) lives in tile si == 0. OOB batch rows of a partial
        # batch tile may hold garbage, but they are discarded on writeback and
        # never mix across rows (max / dot are row-wise).
        cls_acc[...] = tile[:, 0, :]
        max_acc[...] = tile_max

    @pl.when(si > 0)
    def _accumulate():
        max_acc[...] = jnp.maximum(max_acc[...], tile_max)

    @pl.when(si == pl.num_programs(1) - 1)
    def _finalize():
        # torch.cat((max, cls), 1) @ W.T  ==  max @ W[:, :H].T + cls @ W[:, H:].T
        # Two K=H MXU pushes; the MXU is otherwise idle, and this avoids the
        # lane-axis concat / relayout copy of the previous version.
        out_ref[...] = (
            jnp.dot(max_acc[...], w_max_ref[...], preferred_element_type=jnp.float32)
            + jnp.dot(cls_acc[...], w_cls_ref[...], preferred_element_type=jnp.float32)
            + b_ref[...]
        )


def _default_tiles(B, S, H, itemsize, per_buffer_bytes=16 << 20):
    """Pick (bt, ts): biggest seq tile under a v7x-safe per-buffer VMEM budget."""
    # Batch tile: multiple of 8 once B allows it; capped at 8 so a realistic
    # batch gives the "parallel" axis >= 2 grid steps (v7x has 2 TensorCores).
    bt = B if B <= 8 else 8
    if S <= 8:
        ts = S
    else:
        ts = (per_buffer_bytes // max(1, bt * H * itemsize)) // 8 * 8
        ts = max(8, min(ts, S))
    return bt, ts


def word_doc_scale_head(last_hidden_state, fc_w, fc_b, *,
                        batch_tile=None, seq_tile=None):
    """Pallas head. `fc_w` is the torch Linear weight (T, 2H), `fc_b` is (T,).

    `last_hidden_state` is streamed in its native dtype (bf16 recommended);
    no wrapper-side upcast / HBM copy is made.
    """
    B, S, H = last_hidden_state.shape
    T = fc_w.shape[0]
    assert fc_w.shape[1] == 2 * H
    itemsize = jnp.dtype(last_hidden_state.dtype).itemsize

    dbt, dts = _default_tiles(B, S, H, itemsize)
    bt = batch_tile or dbt
    ts = seq_tile or dts

    # Tiny one-time layout plumbing: split the (T, 2H) weight into the half that
    # multiplies the max-pooled features and the half that multiplies the CLS
    # token, transpose, and zero-pad to a lane-dense (H, 128) each, so the
    # kernel's output store is an unmasked full-lane vst.
    fc_w = fc_w.astype(jnp.float32)
    w_max = jnp.zeros((H, LANE_PAD), jnp.float32).at[:, :T].set(fc_w[:, :H].T)
    w_cls = jnp.zeros((H, LANE_PAD), jnp.float32).at[:, :T].set(fc_w[:, H:].T)
    b_pad = jnp.zeros((1, LANE_PAD), jnp.float32).at[:, :T].set(
        fc_b.astype(jnp.float32).reshape(1, T))

    # Explicit VMEM budget: double-buffered input tile + weights/bias/output
    # tiles + scratch, with headroom. Stays well under v7x's 64 MiB.
    hs_tile_bytes  = bt * ts * H * itemsize
    w_bytes        = 2 * H * LANE_PAD * 4
    b_bytes        = LANE_PAD * 4
    out_tile_bytes = bt * LANE_PAD * 4
    scratch_bytes  = 2 * bt * H * 4
    needed = 2 * (hs_tile_bytes + w_bytes + b_bytes + out_tile_bytes) + scratch_bytes
    vmem_limit = int(min(max(needed + (4 << 20), 32 << 20), 100 << 20))

    kernel = functools.partial(head_kernel, seq_len=S, seq_tile=ts)

    out = pl.pallas_call(
        kernel,
        out_shape=jax.ShapeDtypeStruct((B, LANE_PAD), jnp.float32),
        grid=(pl.cdiv(B, bt), pl.cdiv(S, ts)),
        in_specs=[
            pl.BlockSpec((bt, ts, H),       lambda bi, si: (bi, si, 0)),
            pl.BlockSpec((H, LANE_PAD),     lambda bi, si: (0, 0)),
            pl.BlockSpec((H, LANE_PAD),     lambda bi, si: (0, 0)),
            pl.BlockSpec((1, LANE_PAD),     lambda bi, si: (0, 0)),
        ],
        out_specs=pl.BlockSpec((bt, LANE_PAD), lambda bi, si: (bi, 0)),
        scratch_shapes=[
            pltpu.VMEM((bt, H), jnp.float32),   # running max
            pltpu.VMEM((bt, H), jnp.float32),   # CLS token
        ],
        compiler_params=pltpu.CompilerParams(
            dimension_semantics=("parallel", "arbitrary"),
            vmem_limit_bytes=vmem_limit),
    )(last_hidden_state, w_max, w_cls, b_pad)

    return out[:, :T]


def ref_forward(last_hidden_state, fc_w, fc_b):
    """Pure-JAX reference mirroring WordDocScaleModel.forward (eval mode)."""
    hs = last_hidden_state.astype(jnp.float32)
    lm_token_max = jnp.max(hs, axis=1)                         # torch.max(., 1).values
    cls_token = hs[:, 0, :]
    lm_output = jnp.concatenate([lm_token_max, cls_token], axis=1)
    return lm_output @ fc_w.astype(jnp.float32).T + fc_b       # Dropout = identity


if __name__ == "__main__":
    key = jax.random.PRNGKey(0)
    k_hs, k_w = jax.random.split(key)

    # Synthetic backbone output in the backbone's native bf16.
    # TODO(synk): the AutoModel transformer backbone and the document_batch
    # slicing that feeds it are not exercised; its last_hidden_state is the input.
    last_hidden_state = jax.random.normal(
        k_hs, (BATCH, SEQ, HIDDEN), dtype=jnp.float32).astype(jnp.bfloat16)

    # mlp Linear parameters, initialised like _init_weights: normal(0, 0.02), bias 0.
    fc_w = INIT_RANGE * jax.random.normal(
        k_w, (N_TARGETS, 2 * HIDDEN), dtype=jnp.float32)
    fc_b = jnp.zeros((N_TARGETS,), dtype=jnp.float32)

    out = word_doc_scale_head(last_hidden_state, fc_w, fc_b)
    out = jax.block_until_ready(out)

    ref = ref_forward(last_hidden_state, fc_w, fc_b)
    assert out.shape == (BATCH, N_TARGETS)
    assert jnp.allclose(out, ref, atol=1e-4, rtol=1e-4), (out, ref)

    print("KERNEL_OK")
</pallas_src>

<mosaic_0001>
module attributes {stable_mosaic.version = 11 : i64} {
  func.func @head_kernel(%arg0: i32, %arg1: i32, %arg2: memref<2x8x32xbf16, #tpu.memory_space<vmem>>, %arg3: memref<32x128xf32, #tpu.memory_space<vmem>>, %arg4: memref<32x128xf32, #tpu.memory_space<vmem>>, %arg5: memref<1x128xf32, #tpu.memory_space<vmem>>, %arg6: memref<2x128xf32, #tpu.memory_space<vmem>>, %arg7: memref<2x32xf32, #tpu.memory_space<vmem>>, %arg8: memref<2x32xf32, #tpu.memory_space<vmem>>) attributes {dimension_semantics = [#tpu.dimension_semantics<parallel>, #tpu.dimension_semantics<arbitrary>], iteration_bounds = array<i64: 1, 1>, scalar_prefetch = 0 : i64, scratch_operands = 2 : i64, tpu.core_type = #tpu.core_type<tc>, window_params = [{transform_indices = @transform_0, window_bounds = array<i64: 2, 8, 32>}, {pipeline_mode = #tpu.pipeline_mode<synchronous>, transform_indices = @transform_1, window_bounds = array<i64: 32, 128>}, {pipeline_mode = #tpu.pipeline_mode<synchronous>, transform_indices = @transform_2, window_bounds = array<i64: 32, 128>}, {pipeline_mode = #tpu.pipeline_mode<synchronous>, transform_indices = @transform_3, window_bounds = array<i64: 1, 128>}, {transform_indices = @transform_4, window_bounds = array<i64: 2, 128>}]} {
    %c0 = arith.constant 0 : index
    %c0_0 = arith.constant 0 : index
    %c0_1 = arith.constant 0 : index
    %0 = vector.load %arg2[%c0, %c0_0, %c0_1] : memref<2x8x32xbf16, #tpu.memory_space<vmem>>, vector<2x8x32xbf16>
    %1 = arith.extf %0 : vector<2x8x32xbf16> to vector<2x8x32xf32>
    %cst = arith.constant dense<0xFF800000> : vector<2x32xf32>
    %2 = vector.multi_reduction <maximumf>, %1, %cst [1] : vector<2x8x32xf32> to vector<2x32xf32>
    %c0_i32 = arith.constant 0 : i32
    %3 = arith.cmpi eq, %arg1, %c0_i32 : i32
    %4 = arith.extui %3 : i1 to i32
    %c0_i32_2 = arith.constant 0 : i32
    %5 = arith.cmpi ne, %4, %c0_i32_2 : i32
    scf.if %5 {
      %12 = vector.extract_strided_slice %1 {offsets = [0, 0, 0], sizes = [2, 1, 32], strides = [1, 1, 1]} : vector<2x8x32xf32> to vector<2x1x32xf32>
      %13 = vector.shape_cast %12 : vector<2x1x32xf32> to vector<2x32xf32>
      %c0_7 = arith.constant 0 : index
      %c0_8 = arith.constant 0 : index
      %14 = vector.load %arg8[%c0_7, %c0_8] : memref<2x32xf32, #tpu.memory_space<vmem>>, vector<2x32xf32>
      tpu.vector_store %arg8[%c0_7, %c0_8], %13 {strides = array<i32>} : memref<2x32xf32, #tpu.memory_space<vmem>>, vector<2x32xf32>,
      %c0_9 = arith.constant 0 : index
      %c0_10 = arith.constant 0 : index
      %15 = vector.load %arg7[%c0_9, %c0_10] : memref<2x32xf32, #tpu.memory_space<vmem>>, vector<2x32xf32>
      tpu.vector_store %arg7[%c0_9, %c0_10], %2 {strides = array<i32>} : memref<2x32xf32, #tpu.memory_space<vmem>>, vector<2x32xf32>,
    } else {
    }
    %c0_i32_3 = arith.constant 0 : i32
    %6 = arith.cmpi sgt, %arg1, %c0_i32_3 : i32
    %7 = arith.extui %6 : i1 to i32
    %c0_i32_4 = arith.constant 0 : i32
    %8 = arith.cmpi ne, %7, %c0_i32_4 : i32
    scf.if %8 {
      %c0_7 = arith.constant 0 : index
      %c0_8 = arith.constant 0 : index
      %12 = vector.load %arg7[%c0_7, %c0_8] : memref<2x32xf32, #tpu.memory_space<vmem>>, vector<2x32xf32>
      %13 = arith.maximumf %12, %2 : vector<2x32xf32>
      %c0_9 = arith.constant 0 : index
      %c0_10 = arith.constant 0 : index
      %14 = vector.load %arg7[%c0_9, %c0_10] : memref<2x32xf32, #tpu.memory_space<vmem>>, vector<2x32xf32>
      tpu.vector_store %arg7[%c0_9, %c0_10], %13 {strides = array<i32>} : memref<2x32xf32, #tpu.memory_space<vmem>>, vector<2x32xf32>,
    } else {
    }
    %c0_i32_5 = arith.constant 0 : i32
    %9 = arith.cmpi eq, %arg1, %c0_i32_5 : i32
    %10 = arith.extui %9 : i1 to i32
    %c0_i32_6 = arith.constant 0 : i32
    %11 = arith.cmpi ne, %10, %c0_i32_6 : i32
    scf.if %11 {
      %c0_7 = arith.constant 0 : index
      %c0_8 = arith.constant 0 : index
      %12 = vector.load %arg7[%c0_7, %c0_8] : memref<2x32xf32, #tpu.memory_space<vmem>>, vector<2x32xf32>
      %c0_9 = arith.constant 0 : index
      %c0_10 = arith.constant 0 : index
      %13 = vector.load %arg3[%c0_9, %c0_10] : memref<32x128xf32, #tpu.memory_space<vmem>>, vector<32x128xf32>
      %cst_11 = arith.constant dense<0.000000e+00> : vector<2x128xf32>
      %14 = tpu.matmul %12, %13, %cst_11 {dimension_numbers = #tpu.dot_dimension_numbers<[1], [0], [0], [1], [0, 0, 1, 1], [], []>} : vector<2x32xf32>, vector<32x128xf32>, vector<2x128xf32> -> vector<2x128xf32>
      %c0_12 = arith.constant 0 : index
      %c0_13 = arith.constant 0 : index
      %15 = vector.load %arg8[%c0_12, %c0_13] : memref<2x32xf32, #tpu.memory_space<vmem>>, vector<2x32xf32>
      %c0_14 = arith.constant 0 : index
      %c0_15 = arith.constant 0 : index
      %16 = vector.load %arg4[%c0_14, %c0_15] : memref<32x128xf32, #tpu.memory_space<vmem>>, vector<32x128xf32>
      %cst_16 = arith.constant dense<0.000000e+00> : vector<2x128xf32>
      %17 = tpu.matmul %15, %16, %cst_16 {dimension_numbers = #tpu.dot_dimension_numbers<[1], [0], [0], [1], [0, 0, 1, 1], [], []>} : vector<2x32xf32>, vector<32x128xf32>, vector<2x128xf32> -> vector<2x128xf32>
      %18 = arith.addf %14, %17 : vector<2x128xf32>
      %c0_17 = arith.constant 0 : index
      %c0_18 = arith.constant 0 : index
      %19 = vector.load %arg5[%c0_17, %c0_18] : memref<1x128xf32, #tpu.memory_space<vmem>>, vector<1x128xf32>
      %20 = vector.broadcast %19 : vector<1x128xf32> to vector<2x128xf32>
      %21 = arith.addf %18, %20 : vector<2x128xf32>
      %c0_19 = arith.constant 0 : index
      %c0_20 = arith.constant 0 : index
      %22 = vector.load %arg6[%c0_19, %c0_20] : memref<2x128xf32, #tpu.memory_space<vmem>>, vector<2x128xf32>
      tpu.vector_store %arg6[%c0_19, %c0_20], %21 {strides = array<i32>} : memref<2x128xf32, #tpu.memory_space<vmem>>, vector<2x128xf32>,
    } else {
    }
    return
  }
  func.func @transform_0(%arg0: i32, %arg1: i32) -> (i32, i32, i32) {
    %c0_i32 = arith.constant 0 : i32
    %c0_i32_0 = arith.constant 0 : i32
    return %arg0, %arg1, %c0_i32 : i32, i32, i32
  }
  func.func @transform_1(%arg0: i32, %arg1: i32) -> (i32, i32) {
    %c0_i32 = arith.constant 0 : i32
    %c0_i32_0 = arith.constant 0 : i32
    %c0_i32_1 = arith.constant 0 : i32
    return %c0_i32, %c0_i32_0 : i32, i32
  }
  func.func @transform_2(%arg0: i32, %arg1: i32) -> (i32, i32) {
    %c0_i32 = arith.constant 0 : i32
    %c0_i32_0 = arith.constant 0 : i32
    %c0_i32_1 = arith.constant 0 : i32
    return %c0_i32, %c0_i32_0 : i32, i32
  }
  func.func @transform_3(%arg0: i32, %arg1: i32) -> (i32, i32) {
    %c0_i32 = arith.constant 0 : i32
    %c0_i32_0 = arith.constant 0 : i32
    %c0_i32_1 = arith.constant 0 : i32
    return %c0_i32, %c0_i32_0 : i32, i32
  }
  func.func @transform_4(%arg0: i32, %arg1: i32) -> (i32, i32) {
    %c0_i32 = arith.constant 0 : i32
    %c0_i32_0 = arith.constant 0 : i32
    return %arg0, %c0_i32 : i32, i32
  }
}

</mosaic_0001>

<bundles_post_ra>
// kernel: tpu_custom_call.1
= control target key start
LH: loop header
LB: loop body
LE: loop exit
PB: predicated region body
PF: predicated region fallthrough
CT: control target
= control target key end

     0   :  { %9 = vsyncpa [#allocation5], 0  ;;  %s549_s0 = inlined_call_operand.hbm [shape: bf16[2,8,32], index: 0, kind: input, shape index: {}]   ;;  %s550_s1 = inlined_call_operand.hbm [shape: f32[32,128], index: 1, kind: input, shape index: {}]   ;;  %s551_s2 = inlined_call_operand.hbm [shape: f32[32,128], index: 2, kind: input, shape index: {}]   ;;  %s552_s3 = inlined_call_operand.vmem [shape: f32[1,128], index: 3, kind: input, shape index: {}]   ;;  %s553_s4 = inlined_call_operand.hbm [shape: f32[2,128], index: 4, kind: output, shape index: {}]  }
   0x1   :  { %10 = vsyncpa [#allocation8], 0 }
   0x2   :  { %11 = vsyncpa [#allocation6], 0  ;;  %s448_s15 = smov [#allocation7]   ;;  %s354_s19 = scalar_lea.hbm %s550_s1, 512 }
   0x3   :  { %s29_s16 = sshll.u32 %s448_s15, 4  ;;  %p355_p0 = scmp.ne.s32.totalorder %s550_s1, %s354_s19  ;;  %s30_s16 = int_to_ptr.vmem [resolvable:$true] %s29_s16 }
   0x4   :  { %p358_p1 = scmp.lt.u32.totalorder %s354_s19, %s550_s1 }
   0x6   :  { %p360_p2 = pnand %p358_p1, %p355_p0 }
   0x8   :  { %363 = shalt.err (!%p360_p2)
}
   0x9   :  { %s364_s24 = scalar_lea.vmem %s30_s16, 512  ;;  %p369_p4 = scmp.lt.s32.totalorder %s30_s16, %s30_s16 }
   0xa   :  { %p365_p3 = scmp.ne.s32.totalorder %s30_s16, %s364_s24  ;;  %p370_p5 = scmp.lt.s32.totalorder %s364_s24, %s364_s24 }
   0xc   :  { %p371_p6 = por %p370_p5, %p369_p4 }
   0xe   :  { %p372_p7 = pnand %p371_p6, %p365_p3 }
  0x10   :  { %375 = shalt.err (!%p372_p7)
}
  0x11   :  { %s449_s25 = smov 128   ;;  %s450_s26 = smov 8  }
  0x12   :  { %35 = dma.hbm_to_vmem [thread:$0]  %s550_s1, 512, %s30_s16, [#allocation8], %s449_s25, %s449_s25, %s450_s26  }
  0x13   :  { %s451_s29 = smov [#allocation4]   ;;  %s376_s7 = scalar_lea.hbm %s549_s0, 128 }
  0x14   :  { %s17_s30 = sshll.u32 %s451_s29, 4  ;;  %p377_p8 = scmp.ne.s32.totalorder %s549_s0, %s376_s7  ;;  %s18_s30 = int_to_ptr.vmem [resolvable:$true] %s17_s30 }
  0x15   :  { %p380_p9 = scmp.lt.u32.totalorder %s376_s7, %s549_s0 }
  0x17   :  { %p382_p10 = pnand %p380_p9, %p377_p8 }
  0x19   :  { %385 = shalt.err (!%p382_p10)
}
  0x1a   :  { %s386_s12 = scalar_lea.vmem %s18_s30, 128  ;;  %p391_p12 = scmp.lt.s32.totalorder %s18_s30, %s18_s30 }
  0x1b   :  { %p387_p11 = scmp.ne.s32.totalorder %s18_s30, %s386_s12  ;;  %p392_p13 = scmp.lt.s32.totalorder %s386_s12, %s386_s12 }
  0x1d   :  { %p393_p0 = por %p392_p13, %p391_p12 }
  0x1f   :  { %p394_p1 = pnand %p393_p0, %p387_p11 }
  0x21   :  { %397 = shalt.err (!%p394_p1)
}
  0x22   :  { %s452_s1 = smov 64   ;;  %s453_s13 = smov 4  }
  0x23   :  { %23 = dma.hbm_to_vmem [thread:$0]  %s549_s0, 128, %s18_s30, [#allocation5], %s452_s1, %s452_s1, %s453_s13  }
  0x24   :  { %s454_s16 = smov [#allocation9]   ;;  %s398_s20 = scalar_lea.hbm %s551_s2, 512 }
  0x25   :  { %s41_s17 = sshll.u32 %s454_s16, 4  ;;  %p399_p2 = scmp.ne.s32.totalorder %s551_s2, %s398_s20  ;;  %s42_s17 = int_to_ptr.vmem [resolvable:$true] %s41_s17 }
  0x26   :  { %p402_p3 = scmp.lt.u32.totalorder %s398_s20, %s551_s2 }
  0x28   :  { %p404_p4 = pnand %p402_p3, %p399_p2 }
  0x2a   :  { %407 = shalt.err (!%p404_p4)
}
  0x2b   :  { %s408_s27 = scalar_lea.vmem %s42_s17, 512  ;;  %p413_p6 = scmp.lt.s32.totalorder %s42_s17, %s42_s17 }
  0x2c   :  { %p409_p5 = scmp.ne.s32.totalorder %s42_s17, %s408_s27  ;;  %p414_p7 = scmp.lt.s32.totalorder %s408_s27, %s408_s27 }
  0x2e   :  { %p415_p8 = por %p414_p7, %p413_p6 }
  0x30   :  { %p416_p9 = pnand %p415_p8, %p409_p5 }
  0x32   :  { %419 = shalt.err (!%p416_p9)
}
  0x33   :  { %47 = dma.hbm_to_vmem [thread:$0]  %s551_s2, 512, %s42_s17, [#allocation8], %s449_s25, %s449_s25, %s450_s26  }
  0x34   :  { %442 = dma.done.wait [#allocation5], 128  }
  0x35   :  { %443 = vsyncadd [#allocation5], 4294967168 }
  0x36   :  { %444 = dma.done.wait [#allocation8], 1024  }
  0x37   :  { %445 = vsyncadd [#allocation8], 4294966272  ;;  %v455_v0 = vmov 0.0|0.0   ;;  %vm456_vm0 = vmmov 0   ;;  %v457_v1 = vmov 0.0   ;;  %v117_v2 = vld [vmem:[#allocation9] sm:$0xff] }
  0x38   :  { %331 = vmatprep.subr.bf16.mxu0 %v455_v0  ;;  %337 = vmatprep.subr.bf16.mxu1 %v455_v0  ;;  %v118_v3 = vld [vmem:[#allocation9 + $0x8] sm:$0xff]  ;;  %v112_v4 = vld [vmem:[#allocation7] sm:$0xff]  ;;  %v119_v7 = vld [vmem:[#allocation9 + $0x10] sm:$0xff]  ;;  %vm63_vm1 = vcmask 261120   ;;  %vm85_vm2 = vcmask 1041409   ;;  %vm88_vm3 = vcmask 254976  }
  0x39   :  { %317 = vmatprep.mubr.msk.f32.mxu0 %vm456_vm0, %v457_v1  ;;  %328 = vmatprep.mubr.msk.f32.mxu1 %vm456_vm0, %v457_v1  ;;  %v332_v5 = vpack.c.bf16 %v118_v3, %v117_v2  ;;  %v113_v6 = vld [vmem:[#allocation7 + $0x8] sm:$0xff]  ;;  %v120_v8 = vld [vmem:[#allocation9 + $0x18] sm:$0xff]  ;;  %v114_v10 = vld [vmem:[#allocation7 + $0x10] sm:$0xff]  ;;  %s458_s26 = smov [#allocation10]  }
  0x3a   :  { %v338_v9 = vpack.c.bf16 %v113_v6, %v112_v4  ;;  %v115_v11 = vld [vmem:[#allocation7 + $0x18] sm:$0xff]  ;;  %v335_v13 = vpack.c.bf16 %v120_v8, %v119_v7  ;;  %v294_v39 = vld [vmem:[%s552_s3] ss:$0 sm:$0xff]  ;;  %s282_s29 = sshll.u32 %s458_s26, 4  ;;  %s283_s29 = int_to_ptr.vmem [resolvable:$true] %s282_s29 }
  0x3b   :  { %v296_v12 = vld [vmem:[#allocation4] sm:$0xff]   ;;  %333 = vmatpush3.bf16.msra.mxu0 %v332_v5  ;;  %v341_v16 = vpack.c.bf16 %v115_v11, %v114_v10  ;;  %s420_s30 = scalar_lea.vmem %s283_s29, 32  ;;  %p425_p11 = scmp.lt.s32.totalorder %s283_s29, %s283_s29 }
  0x3c   :  { %v297_v14 = vunpack.c.l.bf16 %v296_v12  ;;  %v298_v15 = vunpack.c.h.bf16 %v296_v12  ;;  %339 = vmatpush3.bf16.msra.mxu1 %v338_v9  ;;  %334 = vmatprep.subr.bf16.mxu0 %v455_v0  ;;  %p421_p10 = scmp.ne.s32.totalorder %s283_s29, %s420_s30  ;;  %p426_p12 = scmp.lt.s32.totalorder %s420_s30, %s420_s30 }
  0x3d   :  { %340 = vmatprep.subr.bf16.mxu1 %v455_v0 }
  0x3e   :  { %v64_v17 = vsel %vm63_vm1, %v297_v14, -inf  ;;  %v71_v18 = vsel %vm63_vm1, %v298_v15, -inf  ;;  %v84_v19 = vrot.slane %v298_v15, 7  ;;  %p427_p13 = por %p426_p12, %p425_p11 }
  0x3f   :  { %v65_v20 = vrot.slane %v64_v17, 4  ;;  %v72_v21 = vrot.slane %v71_v18, 4  ;;  %336 = vmatpush3.bf16.msra.mxu0 %v335_v13 }
  0x40   :  { %v86_v22 = vsel %vm85_vm2, %v84_v19, %v297_v14  ;;  %342 = vmatpush3.bf16.msra.mxu1 %v341_v16  ;;  %p428_p0 = pnand %p427_p13, %p421_p10 }
  0x41   :  { %v66_v23 = vmax.f32 %v64_v17, %v65_v20  ;;  %v73_v24 = vmax.f32 %v71_v18, %v72_v21  ;;  %89 = vst.msk [vmem:[#allocation3] sm:$0x3] %vm88_vm3, %v86_v22 }
  0x43   :  { %v67_v25 = vrot.slane %v66_v23, 2  ;;  %v74_v26 = vrot.slane %v73_v24, 2 }
  0x45   :  { %v68_v27 = vmax.f32 %v66_v23, %v67_v25  ;;  %v75_v28 = vmax.f32 %v73_v24, %v74_v26 }
  0x47   :  { %v69_v29 = vrot.slane %v68_v27, 1  ;;  %v76_v30 = vrot.slane %v75_v28, 1 }
  0x48   :  { %v116_v31 = vld [vmem:[#allocation3] sm:$0x3] }
  0x49   :  { %v70_v32 = vmax.f32 %v68_v27, %v69_v29  ;;  %v77_v33 = vmax.f32 %v75_v28, %v76_v30  ;;  %318 = vmatmul.mubr.msk.f32.vlgmr.msra.gmra.mrb[0].mxu0 %vm63_vm1, %v116_v31 }
  0x4b   :  { %v92_v34 = vsel %vm85_vm2, %v77_v33, %v70_v32 }
  0x4c   :  { %94 = vst.msk [vmem:[#allocation2] sm:$0x3] %vm88_vm3, %v92_v34 }
  0x53   :  { %v111_v35 = vld [vmem:[#allocation2] sm:$0x3] }
  0x54   :  { %329 = vmatmul.mubr.msk.f32.vlgmr.msra.gmra.mrb[0].mxu1 %vm63_vm1, %v111_v35 }
 0x11c   :  { %v190_v36 = vpop.f32.mrb[0].mxu0 }
 0x11d   :  { %v319_v37 = vpop.f32.mrb[1].mxu0 }
 0x127   :  { %v263_v38 = vpop.f32.mrb[0].mxu1 }
 0x128   :  { %v264_v40 = vadd.f32 %v263_v38, %v190_v36  ;;  %v330_v41 = vpop.f32.mrb[1].mxu1 }
 0x12a   :  { %v274_v42 = vadd.f32 %v294_v39, %v264_v40 }
 0x12c   :  { %275 = vst [vmem:[#allocation10] sm:$0x3] %v274_v42 }
 0x12d   :  { %431 = shalt.err (!%p428_p0)
}
 0x12e   :  { %s432_s7 = scalar_lea.hbm %s553_s4, 32 }
 0x12f   :  { %p433_p1 = scmp.ne.s32.totalorder %s553_s4, %s432_s7  ;;  %p436_p2 = scmp.lt.u32.totalorder %s432_s7, %s553_s4 }
 0x131   :  { %p438_p3 = pnand %p436_p2, %p433_p1 }
 0x133   :  { %441 = shalt.err (!%p438_p3)
}
 0x134   :  { %285 = dma.vmem_to_hbm [thread:$0]  %s283_s29, 32, %s553_s4, [#allocation6]  }
 0x135   :  { %446 = dma.done.wait [#allocation6], 32  }
 0x136   :  { %447 = vsyncadd [#allocation6], 4294967264 }
 0x137   :  { %289 = vsyncpa [#allocation5], 1 }
 0x138   :  { %290 = vsyncpa [#allocation8], 1 }
 0x139   :  { %291 = vsyncpa [#allocation6], 1 }

</bundles_post_ra>
